<compile_context>
chip_gen: v7x
topology: tpu7x:2x2x1
jax: 0.10.0
libtpu: 0.0.40
codegen_flags: <defaults>
</compile_context>

<pallas_src>
import functools

import jax
import jax.numpy as jnp
from jax.experimental import pallas as pl
from jax.experimental.pallas import tpu as pltpu


def _round_up(x, m):
    return ((x + m - 1) // m) * m


def _vmem_capacity_bytes(default=64 * 1024 * 1024):
    """Best-effort physical VMEM capacity; falls back to the smallest (v7x)."""
    try:
        info = pltpu.get_tpu_info()
        cap = int(getattr(info, "vmem_capacity_bytes", 0))
        if cap > 0:
            return cap
    except Exception:
        pass
    return default


def _label_smoothing_kernel(logit_ref, tgt_ref, out_ref, *, n_rows, vocab_size,
                            ignore_index, smoothing, col_tile, mask_rows,
                            mask_cols):
    """One grid step = one (row_tile, col_tile) tile -> one partial-sum slab."""
    # NOTE: on v7x a bf16 compute path (skip this upcast, accumulate the
    # reduction in f32) would save one full-block VPU sweep; kept f32
    # unconditionally because v5e has no bf16 VALU and it is numerically safer.
    logit = logit_ref[...].astype(jnp.float32)            # (TN, TV) f32
    tgt = tgt_ref[...]                                    # (TN, 1)  int32

    # Fold the negation and the ignore-index mask into the two select operands
    # so the full-width (TN, TV) work is just: compare, select, multiply.
    neg_conf = jnp.float32(-(1.0 - smoothing))
    neg_smooth = jnp.float32(-(smoothing / (vocab_size - 1)))
    keep = tgt != ignore_index                            # (TN, 1)
    conf_r = jnp.where(keep, neg_conf, jnp.float32(0.0))
    smooth_r = jnp.where(keep, neg_smooth, jnp.float32(0.0))

    # Global column index of this tile's lanes; the broadcast compare against
    # the per-row target implements the scatter-to-one-hot.
    col = (pl.program_id(1) * col_tile
           + jax.lax.broadcasted_iota(jnp.int32, (1, logit.shape[1]), 1))
    onehot = col == tgt                                   # (TN, TV)

    contrib = jnp.where(onehot, conf_r, smooth_r) * logit  # (TN, TV)

    # Ragged tails (rows past N, lanes past V) hold garbage that was never
    # DMA'd: zero them with a select (NOT multiply-by-zero) so NaN/Inf cannot
    # poison the sum.  Both masks are statically elided when not needed.
    valid = None
    if mask_rows:
        row = (pl.program_id(0) * logit.shape[0]
               + jax.lax.broadcasted_iota(jnp.int32, (logit.shape[0], 1), 0))
        valid = row < n_rows
    if mask_cols:
        col_ok = col < vocab_size
        valid = col_ok if valid is None else (valid & col_ok)
    if valid is not None:
        contrib = jnp.where(valid, contrib, jnp.float32(0.0))

    # One reduction per tile (amortized over the whole multi-MiB block),
    # stored as a lane-dense (1, 1, 8, 128) slab; wrapper sums [..., 0, 0].
    out_ref[...] = jnp.full(out_ref.shape, jnp.sum(contrib), dtype=jnp.float32)


def label_smoothing_loss(logit, target, *, vocab_size, ignore_index,
                         smoothing=0.1, row_tile=None, col_tile=None,
                         block_budget_bytes=None, min_grid_steps=8):
    """logit: [N, V] float (f32 or bf16), target: [N] int.

    Returns the scalar float32 smoothed-loss sum (same as the PyTorch module).
    """
    N, V = logit.shape
    assert V == vocab_size
    itemsize = jnp.dtype(logit.dtype).itemsize
    elem_bytes = 4  # size tiles by their f32 compute/temporary footprint

    vmem_cap = _vmem_capacity_bytes()
    if block_budget_bytes is None:
        # ~12 MiB on a 64 MiB part (v7x); capped at 16 MiB on 128 MiB parts
        # (v5e/v6e); keeps 2x double-buffered input + ~2.5x f32 temporaries
        # under ~85% of physical VMEM.
        block_budget_bytes = int(min(16 * 2**20,
                                     max(4 * 2**20, 0.85 * vmem_cap / 4.5)))

    # Column (vocab) tiling: full V when it fits, otherwise a lane-aligned
    # multiple of 128 so LLM-sized vocabularies keep row_tile large.
    if col_tile is None:
        max_cols = max(128, block_budget_bytes // (8 * elem_bytes))
        col_tile = V if V <= max_cols else (max_cols // 128) * 128
    assert col_tile == V or col_tile % 128 == 0
    num_col_tiles = pl.cdiv(V, col_tile)

    if row_tile is None:
        rows = block_budget_bytes // max(1, col_tile * elem_bytes)
        rows = max(8, (rows // 8) * 8)
        rows = min(rows, _round_up(N, 8))
        # Keep >= min_grid_steps independent steps so both v7x TensorCores
        # have work and the input DMA pipeline overlaps.
        if pl.cdiv(N, rows) * num_col_tiles < min_grid_steps:
            want_row_tiles = pl.cdiv(min_grid_steps, num_col_tiles)
            rows = min(rows, max(8, _round_up(pl.cdiv(N, want_row_tiles), 8)))
        row_tile = rows
    assert row_tile % 8 == 0
    num_row_tiles = pl.cdiv(N, row_tile)

    # Only the tiny target vector is padded (with ignore_index) so its block
    # reads are well defined; the (N, V) logits are NOT padded or copied.
    n_pad = num_row_tiles * row_tile
    tgt = target.astype(jnp.int32)
    if n_pad != N:
        tgt = jnp.pad(tgt, (0, n_pad - N), constant_values=ignore_index)
    tgt2d = tgt.reshape(n_pad, 1)

    mask_rows = (N % row_tile) != 0
    mask_cols = (V % col_tile) != 0

    kernel = functools.partial(
        _label_smoothing_kernel,
        n_rows=N, vocab_size=vocab_size, ignore_index=ignore_index,
        smoothing=smoothing, col_tile=col_tile,
        mask_rows=mask_rows, mask_cols=mask_cols)

    # VMEM accounting: double-buffered input blocks + ~2.5x block of f32
    # temporaries (one-hot mask / coefficients / masked product) + output
    # slabs + slack, capped at ~85% of physical VMEM (generation aware).
    block_elems = row_tile * col_tile
    needed = (2 * (block_elems * itemsize + row_tile * 4)
              + int(2.5 * block_elems * 4)
              + 2 * (8 * 128 * 4)
              + (2 << 20))
    vmem_limit = max(32 * 2**20, min(needed, int(0.85 * vmem_cap)))

    partials = pl.pallas_call(
        kernel,
        out_shape=jax.ShapeDtypeStruct((num_row_tiles, num_col_tiles, 8, 128),
                                       jnp.float32),
        grid_spec=pltpu.PrefetchScalarGridSpec(
            num_scalar_prefetch=0,
            grid=(num_row_tiles, num_col_tiles),
            in_specs=[
                pl.BlockSpec((row_tile, col_tile), lambda i, j: (i, j)),
                pl.BlockSpec((row_tile, 1), lambda i, j: (i, 0)),
            ],
            out_specs=pl.BlockSpec((1, 1, 8, 128), lambda i, j: (i, j, 0, 0)),
        ),
        compiler_params=pltpu.CompilerParams(
            dimension_semantics=("parallel", "parallel"),
            vmem_limit_bytes=vmem_limit,
        ),
    )(logit, tgt2d)

    # Tiny epilogue: one partial per tile.
    return jnp.sum(partials[:, :, 0, 0])


def _reference(logit, target, *, vocab_size, ignore_index, smoothing):
    confidence = 1.0 - smoothing
    smooth_val = smoothing / (vocab_size - 1)
    N, V = logit.shape
    dist = jnp.full((N, V), smooth_val, dtype=jnp.float32)
    dist = dist.at[jnp.arange(N), target].set(confidence)
    dist = jnp.where((target == ignore_index)[:, None], 0.0, dist)
    return jnp.sum(-dist * logit.astype(jnp.float32))


if __name__ == "__main__":
    key = jax.random.PRNGKey(0)
    ignore_index = 0
    smoothing = 0.1

    # Case 1: f32, ragged N (N % row_tile != 0), multiple row tiles, auto tiles.
    vocab_size, N = 200, 50
    k1, k2, key = jax.random.split(key, 3)
    logit = jax.nn.log_softmax(
        jax.random.normal(k1, (N, vocab_size), dtype=jnp.float32), axis=-1)
    target = jax.random.randint(k2, (N,), 0, vocab_size, dtype=jnp.int32)
    target = target.at[3].set(ignore_index).at[10].set(ignore_index)

    loss = label_smoothing_loss(
        logit, target, vocab_size=vocab_size, ignore_index=ignore_index,
        smoothing=smoothing)
    jax.block_until_ready(loss)
    ref = _reference(logit, target, vocab_size=vocab_size,
                     ignore_index=ignore_index, smoothing=smoothing)
    assert jnp.allclose(loss, ref, rtol=2e-5, atol=1e-3), (loss, ref)

    # Case 2: bf16 logits with explicit tiles -> exercises the vocab-axis
    # tiling (col_tile=128, ragged V) and the ragged-row mask at small shapes.
    vocab_size2, N2 = 300, 37
    k3, k4, key = jax.random.split(key, 3)
    logit2 = jax.nn.log_softmax(
        jax.random.normal(k3, (N2, vocab_size2), dtype=jnp.float32), axis=-1
    ).astype(jnp.bfloat16)
    target2 = jax.random.randint(k4, (N2,), 0, vocab_size2, dtype=jnp.int32)
    target2 = target2.at[0].set(ignore_index).at[17].set(ignore_index)

    loss2 = label_smoothing_loss(
        logit2, target2, vocab_size=vocab_size2, ignore_index=ignore_index,
        smoothing=smoothing, row_tile=16, col_tile=128)
    jax.block_until_ready(loss2)
    ref2 = _reference(logit2, target2, vocab_size=vocab_size2,
                      ignore_index=ignore_index, smoothing=smoothing)
    assert jnp.allclose(loss2, ref2, rtol=2e-5, atol=1e-3), (loss2, ref2)

    print("KERNEL_OK")
</pallas_src>

<mosaic_0001>
module attributes {stable_mosaic.version = 11 : i64} {
  func.func @_label_smoothing_kernel(%arg0: i32, %arg1: i32, %arg2: memref<8x200xf32, #tpu.memory_space<vmem>>, %arg3: memref<8x1xi32, #tpu.memory_space<vmem>>, %arg4: memref<1x1x8x128xf32, #tpu.memory_space<vmem>>) attributes {dimension_semantics = [#tpu.dimension_semantics<parallel>, #tpu.dimension_semantics<parallel>], iteration_bounds = array<i64: 7, 1>, scalar_prefetch = 0 : i64, scratch_operands = 0 : i64, tpu.core_type = #tpu.core_type<tc>, window_params = [{transform_indices = @transform_0, window_bounds = array<i64: 8, 200>}, {transform_indices = @transform_1, window_bounds = array<i64: 8, 1>}, {transform_indices = @transform_2, window_bounds = array<i64: 1, 1, 8, 128>}]} {
    %c0 = arith.constant 0 : index
    %c0_0 = arith.constant 0 : index
    %0 = vector.load %arg2[%c0, %c0_0] : memref<8x200xf32, #tpu.memory_space<vmem>>, vector<8x200xf32>
    %c0_1 = arith.constant 0 : index
    %c0_2 = arith.constant 0 : index
    %1 = vector.load %arg3[%c0_1, %c0_2] : memref<8x1xi32, #tpu.memory_space<vmem>>, vector<8x1xi32>
    %c0_i32 = arith.constant 0 : i32
    %2 = vector.broadcast %c0_i32 : i32 to vector<8x1xi32>
    %3 = arith.cmpi ne, %1, %2 : vector<8x1xi32>
    %cst = arith.constant -0.899999976 : f32
    %cst_3 = arith.constant 0.000000e+00 : f32
    %4 = vector.broadcast %cst : f32 to vector<8x1xf32>
    %5 = vector.broadcast %cst_3 : f32 to vector<8x1xf32>
    %6 = arith.select %3, %4, %5 : vector<8x1xi1>, vector<8x1xf32>
    %cst_4 = arith.constant -5.02512557E-4 : f32
    %cst_5 = arith.constant 0.000000e+00 : f32
    %7 = vector.broadcast %cst_4 : f32 to vector<8x1xf32>
    %8 = vector.broadcast %cst_5 : f32 to vector<8x1xf32>
    %9 = arith.select %3, %7, %8 : vector<8x1xi1>, vector<8x1xf32>
    %c200_i32 = arith.constant 200 : i32
    %10 = arith.muli %arg1, %c200_i32 : i32
    %11 = tpu.iota {dimensions = array<i32: 1>} : vector<1x200xi32>
    %12 = vector.broadcast %10 : i32 to vector<1x200xi32>
    %13 = arith.addi %12, %11 : vector<1x200xi32>
    %14 = vector.broadcast %13 : vector<1x200xi32> to vector<8x200xi32>
    %15 = vector.broadcast %1 : vector<8x1xi32> to vector<8x200xi32>
    %16 = arith.cmpi eq, %14, %15 : vector<8x200xi32>
    %17 = vector.shape_cast %6 : vector<8x1xf32> to vector<8x1xf32>
    %18 = vector.broadcast %17 : vector<8x1xf32> to vector<8x200xf32>
    %19 = vector.shape_cast %9 : vector<8x1xf32> to vector<8x1xf32>
    %20 = vector.broadcast %19 : vector<8x1xf32> to vector<8x200xf32>
    %21 = arith.select %16, %18, %20 : vector<8x200xi1>, vector<8x200xf32>
    %22 = arith.mulf %21, %0 : vector<8x200xf32>
    %c8_i32 = arith.constant 8 : i32
    %23 = arith.muli %arg0, %c8_i32 : i32
    %24 = tpu.iota {dimensions = array<i32: 0>} : vector<8x1xi32>
    %25 = vector.broadcast %23 : i32 to vector<8x1xi32>
    %26 = arith.addi %25, %24 : vector<8x1xi32>
    %c50_i32 = arith.constant 50 : i32
    %27 = vector.broadcast %c50_i32 : i32 to vector<8x1xi32>
    %28 = arith.cmpi slt, %26, %27 : vector<8x1xi32>
    %cst_6 = arith.constant 0.000000e+00 : f32
    %29 = vector.shape_cast %28 : vector<8x1xi1> to vector<8x1xi1>
    %30 = vector.broadcast %29 : vector<8x1xi1> to vector<8x200xi1>
    %31 = vector.broadcast %cst_6 : f32 to vector<8x200xf32>
    %32 = arith.select %30, %22, %31 : vector<8x200xi1>, vector<8x200xf32>
    %33 = vector.shape_cast %32 : vector<8x200xf32> to vector<1x8x200xf32>
    %cst_7 = arith.constant dense<0.000000e+00> : vector<1xf32>
    %34 = vector.multi_reduction <add>, %33, %cst_7 [1, 2] : vector<1x8x200xf32> to vector<1xf32>
    %35 = vector.shape_cast %34 : vector<1xf32> to vector<1x1x1xf32>
    %36 = vector.extract %35[0, 0, 0] : f32 from vector<1x1x1xf32>
    %37 = vector.broadcast %36 : f32 to vector<1x1x8x128xf32>
    %c0_8 = arith.constant 0 : index
    %c0_9 = arith.constant 0 : index
    %c0_10 = arith.constant 0 : index
    %c0_11 = arith.constant 0 : index
    %38 = vector.load %arg4[%c0_8, %c0_9, %c0_10, %c0_11] : memref<1x1x8x128xf32, #tpu.memory_space<vmem>>, vector<1x1x8x128xf32>
    tpu.vector_store %arg4[%c0_8, %c0_9, %c0_10, %c0_11], %37 {strides = array<i32>} : memref<1x1x8x128xf32, #tpu.memory_space<vmem>>, vector<1x1x8x128xf32>,
    return
  }
  func.func @transform_0(%arg0: i32, %arg1: i32) -> (i32, i32) {
    %c0_i32 = arith.constant 0 : i32
    return %arg0, %arg1 : i32, i32
  }
  func.func @transform_1(%arg0: i32, %arg1: i32) -> (i32, i32) {
    %c0_i32 = arith.constant 0 : i32
    %c0_i32_0 = arith.constant 0 : i32
    return %arg0, %c0_i32 : i32, i32
  }
  func.func @transform_2(%arg0: i32, %arg1: i32) -> (i32, i32, i32, i32) {
    %c0_i32 = arith.constant 0 : i32
    %c0_i32_0 = arith.constant 0 : i32
    %c0_i32_1 = arith.constant 0 : i32
    return %arg0, %arg1, %c0_i32, %c0_i32_0 : i32, i32, i32, i32
  }
}

</mosaic_0001>

<bundles_post_ra>
// kernel: tpu_custom_call.1
= control target key start
LH: loop header
LB: loop body
LE: loop exit
PB: predicated region body
PF: predicated region fallthrough
CT: control target
= control target key end

     0   :  { %7 = vsyncpa [#allocation3], 0  ;;  %s756_s0 = inlined_call_operand.hbm [shape: f32[50,200], index: 0, kind: input, shape index: {}]   ;;  %s757_s1 = inlined_call_operand.vmem [shape: s32[56,1], index: 1, kind: input, shape index: {}]   ;;  %s758_s2 = inlined_call_operand.hbm [shape: f32[7,1,8,128], index: 2, kind: output, shape index: {}]  }
   0x1   :  { %9 = vsyncpa [#allocation3 + $0x1], 0 }
   0x2   :  { %10 = vsyncpa [#allocation4], 0 }
   0x3   :  { %12 = vsyncpa [#allocation4 + $0x1], 0  ;;  %s579_s9 = smov 0   ;;  %s581_s10 = smov 0  }
   0x4   :  { %s583_s11 = smov 0   ;;  %s585_s12 = smov 0  }
   0x5   :  { %s587_s13 = smov 0   ;;  %s589_s14 = smov 0  }
   0x6 LB: > { %s361_s15 = sadd.s32 4294967295, %s558_s14   ;;  %s362_s16 = sadd.s32 4294967294, %s558_s14   ;;  %s558_s14 = sphi %s589_s14, %s18_s14   ;;  %s554_s13 = sphi %s587_s13, %s773_s13   ;;  %s550_s12 = sphi %s585_s12, %s772_s12   ;;  %s546_s11 = sphi %s583_s11, %s771_s11   ;;  %s542_s10 = sphi %s581_s10, %s770_s10   ;;  %s538_s9 = sphi %s579_s9, %s769_s9  }
   0x7   : > { %s30_s17 = sadd.s32 1, %s554_s13  ;;  %s39_s18 = sadd.s32 1, %s546_s11 }
   0x8   : > { %p32_p0 = scmp.ge.s32.totalorder %s30_s17, 7  ;;  %p46_p1 = scmp.ne.s32.totalorder %s546_s11, %s542_s10 }
   0x9   : > { %p47_p2 = scmp.eq.s32.totalorder %s558_s14, 0  ;;  %p52_p3 = scmp.ne.s32.totalorder %s542_s10, %s538_s9 }
   0xa   : > { %s775_s17 = smov (%p32_p0, %s30_s17), 0  ;;  %p53_p5 = scmp.eq.s32.totalorder %s361_s15, 0 }
   0xb   : > { %p620_p4 = por %p47_p2, %p46_p1  ;;  %s34_s20 = ssub.s32 %s554_s13, %s775_s17 }
   0xc   : > { %p104_p6 = scmp.eq.s32.totalorder %s361_s15, 6  ;;  %p37_p7 = scmp.eq.s32.totalorder %s34_s20, 0 }
   0xd   : > { %p626_p8 = por %p53_p5, %p52_p3  ;;  %p110_p10 = scmp.eq.s32.totalorder %s362_s16, 6 }
   0xe   : > { %p630_p9 = por %p104_p6, %p46_p1  ;;  %p392_p12 = scmp.lt.s32.totalorder %s558_s14, 7 }
   0xf   : > { %s635_s23 = scalar_select %p37_p7, %s546_s11, %s39_s18  }
  0x10   : > { %s762_s22 = scalar_select %p630_p9, 1, 0 }
  0x11   : > { %p637_p11 = por %p110_p10, %p52_p3  ;;  %s130_s25 = sand.u32 1, %s546_s11  }
  0x12   : > { %s365_s26 = sshll.u32 %s130_s25, 4  ;;  %s377_s27 = sshll.u32 %s554_s13, 8 }
  0x13   : > { %s763_s24 = scalar_select %p637_p11, 1, 0 }
  0x14   : > { %s647_s30 = scalar_lea.hbm %s756_s0, %s377_s27  ;;  %s134_s3 = scalar_lea.vmem [#allocation2], %s365_s26 }
  0x15   : > { %s144_s4 = sshll.u32 %s134_s3, 4  ;;  %p653_p13 = pnand %p392_p12, %p620_p4  ;;  %s649_s4 = int_to_ptr.vmem [resolvable:$true] %s144_s4 }
  0x16   : > { %s131_s6 = scalar_lea.sflag [#allocation3], %s130_s25  ;;  %s446_s7 = scalar_lea.hbm %s647_s30, 256 }
  0x17   : > { %p447_p2 = scmp.ne.s32.totalorder %s647_s30, %s446_s7  ;;  %p448_p3 = pneg %p653_p13 }
  0x18   : > { %s451_s16 = scalar_lea.hbm %s756_s0, 1792  ;;  %p452_p4 = scmp.lt.u32.totalorder %s647_s30, %s756_s0 }
  0x19   : > { %p449_p5 = pnand %p448_p3, %p447_p2  ;;  %p453_p7 = scmp.lt.u32.totalorder %s451_s16, %s446_s7 }
  0x1a   : > { %p455_p12 = scmp.lt.u32.totalorder %s446_s7, %s647_s30 }
  0x1b   : > { %p450_p6 = pneg %p449_p5  ;;  %p454_p10 = por %p453_p7, %p452_p4 }
  0x1d   : > { %p456_p0 = por %p455_p12, %p454_p10 }
  0x1f   : > { %p457_p1 = pnand %p456_p0, %p450_p6 }
  0x21   : > { %460 = shalt.err (!%p457_p1)
}
  0x22   : > { %s461_s20 = scalar_lea.vmem %s649_s4, 256  ;;  %s560_s25 = smov [#allocation2]  }
  0x23   : > { %p462_p2 = scmp.ne.s32.totalorder %s649_s4, %s461_s20  ;;  %s466_s26 = sshll.u32 %s560_s25, 4  ;;  %s467_s26 = int_to_ptr.vmem [resolvable:$false] %s466_s26 }
  0x24   : > { %s468_s27 = scalar_lea.vmem %s467_s26, 512  ;;  %p469_p9 = scmp.lt.s32.totalorder %s649_s4, %s467_s26 }
  0x25   : > { %p464_p5 = pnand %p462_p2, %p448_p3  ;;  %p470_p4 = scmp.lt.s32.totalorder %s468_s27, %s461_s20 }
  0x27   : > { %p465_p11 = pneg %p464_p5  ;;  %p471_p7 = por %p470_p4, %p469_p9 }
  0x29   : > { %p472_p10 = pnand %p471_p7, %p465_p11 }
  0x2b   : > { %475 = shalt.err (!%p472_p10)
}
  0x2c   : > { %387 = dma.hbm_to_vmem [thread:$0]  (!%p653_p13), %s647_s30, 256, %s649_s4, %s131_s6  }
  0x2d   : > { %p765_p0 = scmp.lt.s32.totalorder %s558_s14, 8  ;;  %p766_p1 = scmp.ge.s32.totalorder %s558_s14, 1 }
  0x2f   : > { %p157_p3 = pnand %p766_p1, %p765_p0 }
  0x30   : > { %s689_s28 = sand.u32 (!%p157_p3), 1, %s542_s10  }
  0x31   : > { %160 = sbr.rel (%p157_p3) target bundleno = 422 (0x1a6), region = 28  ;;  %s369_s29 = sshll.u32 (!%p157_p3), %s689_s28, 4 }
  0x32   : > { %s163_s3 = scalar_lea.sflag (!%p157_p3), [#allocation3], %s689_s28  ;;  %s166_s7 = scalar_lea.vmem (!%p157_p3), [#allocation2], %s369_s29 }
  0x38   : > { %529 = dma.done.wait (%p626_p8), %s163_s3, 256  }
  0x39   : > { %531 = vsyncadd (%p626_p8), %s163_s3, 4294967040  ;;  %p192_p9 = scmp.lt.s32.totalorder %s550_s12, 6  ;;  %v561_v0 = vmov 0   ;;  %v562_v2 = vmov 0.0   ;;  %v203_v5 = vlaneseq  ;;  %s372_s21 = sshll.u32 %s550_s12, 3  ;;  %v196_v13 = vld [vmem:[%s166_s7] sm:$0xff] }
  0x3a   : > { %444 = vset.pattern.permute.xlu0 %v561_v0  ;;  %445 = vset.pattern.permute.xlu1 %v561_v0  ;;  %v231_v8 = vstv %s372_s21  ;;  %v197_v14 = vld [vmem:[%s166_s7 + $0x8] sm:$0xff]  ;;  %vm238_vm4 = vcmask 588800   ;;  %s370_s15 = sshll.u32 %s689_s28, 3  ;;  %s374_s19 = sshll.u32 %s550_s12, 7 }
  0x3b   : > { %s193_s30 = scalar_select %p192_p9, %s550_s12, 6  ;;  %v204_v6 = vand.u32 127, %v203_v5  ;;  %v230_v7 = vshrl.u32 %v203_v5, 7 }
  0x3c   : > { %s190_s16 = scalar_lea.vmem [#allocation5], %s370_s15  ;;  %s710_s27 = scalar_lea.hbm %s758_s2, %s374_s19 }
  0x3d   : > { %s371_s4 = sshll.u32 %s193_s30, 3  ;;  %v205_v9 = vadd.s32 128, %v204_v6  ;;  %v232_v11 = vadd.s32 %v231_v8, %v230_v7  ;;  %s267_s18 = sshll.u32 %s190_s16, 4  ;;  %s705_s18 = int_to_ptr.vmem [resolvable:$true] %s267_s18 }
  0x3e   : > { %s195_s8 = scalar_lea.vmem %s757_s1, %s371_s4  ;;  %s253_s29 = scalar_lea.sflag [#allocation4], %s689_s28 }
  0x3f   : > { %v198_v1 = vld [vmem:[%s195_s8] sm:$0xff]  ;;  %vm233_vm3 = vcmp.lt.s32.totalorder %v232_v11, 50  ;;  %s476_s3 = scalar_lea.vmem %s705_s18, 128  ;;  %p767_p11 = scmp.ne.s32.totalorder %s762_s22, 0 }
  0x40   : > { %210 = vperm.xlu0 %444, %v198_v1   ;;  %vm199_vm0 = vcmp.ne.s32.totalorder %v198_v1, 0  ;;  %p477_p8 = scmp.ne.s32.totalorder %s705_s18, %s476_s3  ;;  %s563_s12 = smov [#allocation5]  }
  0x41   : > { %v201_v3 = vsel %vm199_vm0, -0.00050251256, %v562_v2  ;;  %v200_v4 = vsel %vm199_vm0, -0.9, %v562_v2  ;;  %s480_s7 = sshll.u32 %s563_s12, 4  ;;  %s481_s7 = int_to_ptr.vmem [resolvable:$false] %s480_s7 }
  0x42   : > { %221 = vperm.xlu1 %445, %v201_v3   ;;  %p478_p13 = pnand %p477_p8, %p767_p11  ;;  %s482_s30 = scalar_lea.vmem %s481_s7, 256 }
  0x43   : > { %p483_p12 = scmp.lt.s32.totalorder %s705_s18, %s481_s7  ;;  %p484_p2 = scmp.lt.s32.totalorder %s482_s30, %s476_s3 }
  0x44   : > { %216 = vperm.xlu0 %444, %v200_v4   ;;  %p479_p6 = pneg %p478_p13 }
  0x45   : > { %p485_p5 = por %p484_p2, %p483_p12 }
  0x47   : > { %p486_p4 = pnand %p485_p5, %p479_p6 }
  0xbf   : > { %v211_v10 = vpop.permute.xlu0 %210 }
  0xc0   : > { %vm212_vm1 = vcmp.eq.s32.totalorder %v204_v6, %v211_v10  ;;  %vm213_vm2 = vcmp.eq.s32.totalorder %v205_v9, %v211_v10 }
  0xc1   : > { %v222_v12 = vpop.permute.xlu1 %221 }
  0xc3   : > { %v217_v15 = vpop.permute.xlu0 %216 }
  0xc4   : > { %v224_v16 = vsel %vm212_vm1, %v217_v15, %v222_v12  ;;  %v225_v17 = vsel %vm213_vm2, %v217_v15, %v222_v12 }
  0xc5   : > { %v226_v18 = vmul.f32 %v224_v16, %v196_v13  ;;  %v227_v19 = vmul.f32 %v225_v17, %v197_v14 }
  0xc7   : > { %v236_v20 = vsel %vm233_vm3, %v226_v18, 0.0  ;;  %v237_v21 = vsel %vm233_vm3, %v227_v19, 0.0 }
  0xc8   : > { %v239_v22 = vsel %vm238_vm4, %v237_v21, 0.0 }
  0xc9   : > { %v240_v23 = vadd.f32 %v239_v22, %v236_v20 }
  0xcb   : > { %241 = vadd.xlane.f32.xlu1 %v240_v23 }
 0x158   : > { %v242_v24 = vpop.xlane.xlu1 %241 }
 0x159   : > { %v243_v25 = vrot.slane %v242_v24, 4 }
 0x15b   : > { %v244_v26 = vadd.f32 %v243_v25, %v242_v24 }
 0x15d   : > { %v245_v27 = vrot.slane %v244_v26, 2 }
 0x15f   : > { %v246_v28 = vadd.f32 %v245_v27, %v244_v26 }
 0x161   : > { %v247_v29 = vrot.slane %v246_v28, 1 }
 0x163   : > { %v248_v30 = vadd.f32 %v247_v29, %v246_v28 }
 0x165   : > { %378 = vpush %v248_v30 }
 0x196   : > { %s379_s20 = spop %378 }
 0x197   : > { %v250_v31 = vstv %s379_s20 }
 0x198   : > { %251 = vst [vmem:[%s190_s16] sm:$0xff] %v250_v31 }
 0x199   : > { %489 = shalt.err (!%p486_p4)
}
 0x19a   : > { %s490_s28 = scalar_lea.hbm %s710_s27, 128  ;;  %s494_s6 = scalar_lea.hbm %s758_s2, 896 }
 0x19b   : > { %p491_p7 = scmp.ne.s32.totalorder %s710_s27, %s490_s28  ;;  %p495_p1 = scmp.lt.u32.totalorder %s710_s27, %s758_s2 }
 0x19c   : > { %p496_p3 = scmp.lt.u32.totalorder %s494_s6, %s490_s28  ;;  %p498_p8 = scmp.lt.u32.totalorder %s490_s28, %s710_s27 }
 0x19d   : > { %p492_p10 = pnand %p491_p7, %p767_p11 }
 0x19e   : > { %p497_p9 = por %p496_p3, %p495_p1 }
 0x19f   : > { %p493_p0 = pneg %p492_p10 }
 0x1a0   : > { %p499_p13 = por %p498_p8, %p497_p9 }
 0x1a2   : > { %p500_p6 = pnand %p499_p13, %p493_p0 }
 0x1a4   : > { %503 = shalt.err (!%p500_p6)
}
 0x1a5   : > { %382 = dma.vmem_to_hbm [thread:$0]  (%p767_p11), %s705_s18, 128, %s710_s27, %s253_s29  }
 0x1a6 PF: > { %p393_p12 = scmp.ge.s32.totalorder %s558_s14, 2  ;;  %s279_s15 = sand.u32 1, %s538_s9  }
 0x1a7   : > { %p768_p2 = scmp.ne.s32.totalorder %s763_s24, 0  ;;  %s280_s16 = scalar_lea.sflag [#allocation4], %s279_s15 }
 0x1a9   : > { %p389_p5 = pnand %p393_p12, %p768_p2 }
 0x1ab   : > { %533 = dma.done.wait (!%p389_p5), %s280_s16, 128  }
 0x1ac   : > { %535 = vsyncadd (!%p389_p5), %s280_s16, 4294967168  ;;  %s18_s14 = sadd.s32 1, %s558_s14   ;;  %s769_s9 = smov %s542_s10 }
 0x1ad   : > { %p15_p4 = scmp.ge.s32.totalorder %s18_s14, 9   ;;  %s770_s10 = smov %s546_s11 }
 0x1ae   : > { %s771_s11 = smov %s635_s23  ;;  %s772_s12 = smov %s554_s13 }
 0x1af   : > { %s773_s13 = smov %s775_s17  ;;  %17 = sbr.rel (!%p15_p4) target bundleno = 6 (0x6), region = 76 }
 0x1b6   :  { %285 = vsyncpa [#allocation3], 1 }
 0x1b7   :  { %287 = vsyncpa [#allocation3 + $0x1], 1 }
 0x1b8   :  { %288 = vsyncpa [#allocation4], 1 }
 0x1b9   :  { %290 = vsyncpa [#allocation4 + $0x1], 1 }

</bundles_post_ra>
